<compile_context>
chip_gen: v7x
topology: tpu7x:2x2x1
jax: 0.10.0
libtpu: 0.0.40
codegen_flags: <defaults>
</compile_context>

<pallas_src>
import functools

import jax
import jax.numpy as jnp
import numpy as np
from jax.experimental import pallas as pl
from jax.experimental.pallas import tpu as pltpu

_LANE = 128
_SUBLANE = 8


def _round_up(x, m):
    return ((x + m - 1) // m) * m


def _sigmoid(x):
    # One EUP transcendental per element, numerically equal to the logistic.
    return 0.5 * jnp.tanh(0.5 * x) + 0.5


def _convlstm_kernel(x_ref, w_ref, b_ref, c_ref, h_out_ref, c_out_ref, *,
                     K, W_pad, Pg, Hcs):
    """One batch element per grid step.

    Layout: lanes = flattened (row-major, width padded to W_pad) spatial
    pixels; sublanes = channels.

    x_ref     : (1, C_pad, P_in)    bf16  spatially padded stacked (x, h_prev)
    w_ref     : (K*K, 4*Hcs, C_pad) bf16  per-tap gate weights (gate-padded rows)
    b_ref     : (4*Hcs, 1)          f32   gate bias
    c_ref     : (1, Hcs, Pg)        f32   previous cell state
    h_out_ref : (1, Hcs, Pg)        bf16
    c_out_ref : (1, Hcs, Pg)        f32
    """
    G4 = 4 * Hcs

    # Fused im2col: K*K statically shifted MXU dots of depth C_pad, f32 acc.
    acc = jnp.zeros((G4, Pg), jnp.float32)
    for kh in range(K):
        for kw in range(K):
            t = kh * K + kw
            off = kh * W_pad + kw                      # static lane offset
            xs = x_ref[0, :, off:off + Pg]             # (C_pad, Pg) bf16
            acc = acc + jnp.dot(w_ref[t], xs,
                                preferred_element_type=jnp.float32)
    acc = acc + b_ref[...]                             # (G4, 1) lane-broadcast

    # Gate order matches torch.chunk(4, dim=1): in, remember, out, cell.
    # Hcs is a multiple of 8, so every gate slice is sublane-aligned.
    in_gate = _sigmoid(acc[0 * Hcs:1 * Hcs])
    rem_gate = _sigmoid(acc[1 * Hcs:2 * Hcs])
    out_gate = _sigmoid(acc[2 * Hcs:3 * Hcs])
    cell_gate = jnp.tanh(acc[3 * Hcs:4 * Hcs])

    cell = rem_gate * c_ref[0] + in_gate * cell_gate
    hidden = out_gate * jnp.tanh(cell)

    c_out_ref[0] = cell
    h_out_ref[0] = hidden.astype(h_out_ref.dtype)      # bf16 writeback


def conv_lstm_cell(x_nchw, prev_hidden_nchw, prev_cell_nchw, weight_oihw, bias):
    """Forward pass of ConvLSTMCell.

    x_nchw           : (B, Cin, H, W)
    prev_hidden_nchw : (B, Hc, H, W)   (consumed in bf16)
    prev_cell_nchw   : (B, Hc, H, W)   (kept in f32)
    weight_oihw      : (4*Hc, Cin+Hc, K, K)   PyTorch Conv2d layout
    bias             : (4*Hc,)

    Returns (hidden, cell) in NCHW: hidden is bf16, cell is f32.
    """
    B, Cin, H, W = x_nchw.shape
    Hc = prev_hidden_nchw.shape[1]
    K = weight_oihw.shape[-1]
    # PyTorch padding=K//2 equals symmetric SAME only for odd K.
    assert K % 2 == 1, "ConvLSTMCell kernel only supports odd kernel sizes"
    pad = K // 2
    C = Cin + Hc

    C_pad = _round_up(C, _SUBLANE)       # channels on sublanes
    Hcs = _round_up(Hc, _SUBLANE)        # per-gate sublane padding (NOT 128)
    G4 = 4 * Hcs

    H_pad, W_pad = H + 2 * pad, W + 2 * pad
    Pg = _round_up(H * W_pad, _LANE)     # output pixels on lanes (row-major, padded width)
    max_off = (K - 1) * W_pad + (K - 1)
    P_in = _round_up(max(H_pad * W_pad, Pg + max_off), _LANE)

    # ---- stacked input: concat channels, spatial zero-pad, flatten pixels ----
    stacked = jnp.concatenate([x_nchw.astype(jnp.bfloat16),
                               prev_hidden_nchw.astype(jnp.bfloat16)], axis=1)
    stacked = jnp.pad(stacked, ((0, 0), (0, C_pad - C), (pad, pad), (pad, pad)))
    x_flat = stacked.reshape(B, C_pad, H_pad * W_pad)
    x_flat = jnp.pad(x_flat, ((0, 0), (0, 0), (0, P_in - H_pad * W_pad)))

    # ---- weights: OIHW -> (tap, 4*Hcs, C_pad); each gate padded to Hcs rows ----
    w = weight_oihw.reshape(4, Hc, C, K, K)
    w = jnp.pad(w, ((0, 0), (0, Hcs - Hc), (0, C_pad - C), (0, 0), (0, 0)))
    w = jnp.transpose(w, (3, 4, 0, 1, 2)).reshape(K * K, G4, C_pad)
    w = w.astype(jnp.bfloat16)

    b = jnp.pad(bias.astype(jnp.float32).reshape(4, Hc),
                ((0, 0), (0, Hcs - Hc))).reshape(G4, 1)

    # ---- previous cell state in the same (channels, flattened pixels) layout ----
    c_prev = jnp.pad(prev_cell_nchw.astype(jnp.float32),
                     ((0, 0), (0, Hcs - Hc), (0, 0), (0, W_pad - W)))
    c_prev = c_prev.reshape(B, Hcs, H * W_pad)
    c_prev = jnp.pad(c_prev, ((0, 0), (0, 0), (0, Pg - H * W_pad)))

    kernel = functools.partial(_convlstm_kernel,
                               K=K, W_pad=W_pad, Pg=Pg, Hcs=Hcs)

    # NOTE: for very large H*W one would tile the pixel (lane) axis with a
    # halo instead of one image per grid step; at these sizes a full image per
    # step fits easily in VMEM and keeps the grid >= 2 parallel steps via B.
    grid_spec = pltpu.PrefetchScalarGridSpec(
        num_scalar_prefetch=0,
        grid=(B,),
        in_specs=[
            pl.BlockSpec((1, C_pad, P_in), lambda bi: (bi, 0, 0)),
            # Grid-invariant (resident) weight / bias blocks.
            pl.BlockSpec((K * K, G4, C_pad), lambda bi: (0, 0, 0)),
            pl.BlockSpec((G4, 1), lambda bi: (0, 0)),
            pl.BlockSpec((1, Hcs, Pg), lambda bi: (bi, 0, 0)),
        ],
        out_specs=[
            pl.BlockSpec((1, Hcs, Pg), lambda bi: (bi, 0, 0)),
            pl.BlockSpec((1, Hcs, Pg), lambda bi: (bi, 0, 0)),
        ],
    )

    h_flat, c_flat = pl.pallas_call(
        kernel,
        out_shape=(
            jax.ShapeDtypeStruct((B, Hcs, Pg), jnp.bfloat16),   # h in bf16
            jax.ShapeDtypeStruct((B, Hcs, Pg), jnp.float32),    # c stays f32
        ),
        grid_spec=grid_spec,
        compiler_params=pltpu.CompilerParams(
            dimension_semantics=("parallel",),
            vmem_limit_bytes=32 * 1024 * 1024),
    )(x_flat, w, b, c_prev)

    # Back to NCHW (pure slicing/reshape; no transposes in this layout).
    def unflatten(a):
        return a[:, :Hc, :H * W_pad].reshape(B, Hc, H, W_pad)[..., :W]

    return unflatten(h_flat), unflatten(c_flat)


def _reference(x_nchw, h_prev, c_prev, weight_oihw, bias):
    """Pure-JAX (f32) reference mirroring the PyTorch module."""
    stacked = jnp.concatenate([x_nchw, h_prev], axis=1)              # NCHW
    gates = jax.lax.conv_general_dilated(
        stacked, weight_oihw, window_strides=(1, 1), padding="SAME",
        dimension_numbers=("NCHW", "OIHW", "NCHW"))
    gates = gates + bias[None, :, None, None]
    in_g, rem_g, out_g, cell_g = jnp.split(gates, 4, axis=1)
    in_g = jax.nn.sigmoid(in_g)
    rem_g = jax.nn.sigmoid(rem_g)
    out_g = jax.nn.sigmoid(out_g)
    cell_g = jnp.tanh(cell_g)
    cell = rem_g * c_prev + in_g * cell_g
    hidden = out_g * jnp.tanh(cell)
    return hidden, cell


def _np_f32(a):
    return np.asarray(jnp.asarray(a, jnp.float32))


if __name__ == "__main__":
    # Small shapes consistent with the module.
    B, Cin, H, W = 2, 4, 16, 16
    Hc, K = 8, 3

    key = jax.random.PRNGKey(0)
    kx1, kx2, kw_key, kb_key = jax.random.split(key, 4)

    x1 = jax.random.normal(kx1, (B, Cin, H, W), dtype=jnp.float32)
    x2 = jax.random.normal(kx2, (B, Cin, H, W), dtype=jnp.float32)

    # Deterministic Xavier-uniform init for the Gates conv weight.
    fan_in = (Cin + Hc) * K * K
    fan_out = 4 * Hc * K * K
    bound = float(np.sqrt(6.0 / (fan_in + fan_out)))
    weight = jax.random.uniform(kw_key, (4 * Hc, Cin + Hc, K, K),
                                minval=-bound, maxval=bound, dtype=jnp.float32)
    # PyTorch Conv2d default bias init: U(-1/sqrt(fan_in), 1/sqrt(fan_in)).
    bbound = float(1.0 / np.sqrt(fan_in))
    bias = jax.random.uniform(kb_key, (4 * Hc,), minval=-bbound, maxval=bbound,
                              dtype=jnp.float32)

    # Step 1: prev_state is None in the PyTorch module -> zeros.
    h0 = jnp.zeros((B, Hc, H, W), jnp.float32)
    c0 = jnp.zeros((B, Hc, H, W), jnp.float32)

    h1, c1 = conv_lstm_cell(x1, h0, c0, weight, bias)
    h1 = jax.block_until_ready(h1)
    c1 = jax.block_until_ready(c1)

    h1_ref, c1_ref = _reference(x1, h0, c0, weight, bias)
    # bf16 matmul inputs / bf16 h output -> loosened tolerance vs f32 reference.
    np.testing.assert_allclose(_np_f32(h1), np.asarray(h1_ref), rtol=2e-2, atol=2e-2)
    np.testing.assert_allclose(_np_f32(c1), np.asarray(c1_ref), rtol=2e-2, atol=2e-2)

    # Step 2: exercises the nonzero hidden/cell state path (as in the module).
    h2, c2 = conv_lstm_cell(x2, h1, c1, weight, bias)
    h2 = jax.block_until_ready(h2)
    c2 = jax.block_until_ready(c2)

    h2_ref, c2_ref = _reference(x2, h1_ref, c1_ref, weight, bias)
    np.testing.assert_allclose(_np_f32(h2), np.asarray(h2_ref), rtol=3e-2, atol=3e-2)
    np.testing.assert_allclose(_np_f32(c2), np.asarray(c2_ref), rtol=3e-2, atol=3e-2)

    print("KERNEL_OK")
</pallas_src>

<mosaic_0001>
module attributes {stable_mosaic.version = 11 : i64} {
  func.func @_convlstm_kernel(%arg0: i32, %arg1: memref<1x16x512xbf16, #tpu.memory_space<vmem>>, %arg2: memref<9x32x16xbf16, #tpu.memory_space<vmem>>, %arg3: memref<32x1xf32, #tpu.memory_space<vmem>>, %arg4: memref<1x8x384xf32, #tpu.memory_space<vmem>>, %arg5: memref<1x8x384xbf16, #tpu.memory_space<vmem>>, %arg6: memref<1x8x384xf32, #tpu.memory_space<vmem>>) attributes {dimension_semantics = [#tpu.dimension_semantics<parallel>], iteration_bounds = array<i64: 2>, scalar_prefetch = 0 : i64, scratch_operands = 0 : i64, tpu.core_type = #tpu.core_type<tc>, window_params = [{transform_indices = @transform_0, window_bounds = array<i64: 1, 16, 512>}, {pipeline_mode = #tpu.pipeline_mode<synchronous>, transform_indices = @transform_1, window_bounds = array<i64: 9, 32, 16>}, {pipeline_mode = #tpu.pipeline_mode<synchronous>, transform_indices = @transform_2, window_bounds = array<i64: 32, 1>}, {transform_indices = @transform_3, window_bounds = array<i64: 1, 8, 384>}, {transform_indices = @transform_4, window_bounds = array<i64: 1, 8, 384>}, {transform_indices = @transform_5, window_bounds = array<i64: 1, 8, 384>}]} {
    %cst = arith.constant 0.000000e+00 : f32
    %0 = vector.broadcast %cst : f32 to vector<32x384xf32>
    %c0 = arith.constant 0 : index
    %c0_0 = arith.constant 0 : index
    %c0_1 = arith.constant 0 : index
    %1 = vector.load %arg1[%c0, %c0_0, %c0_1] : memref<1x16x512xbf16, #tpu.memory_space<vmem>>, vector<1x16x384xbf16>
    %2 = vector.shape_cast %1 : vector<1x16x384xbf16> to vector<16x384xbf16>
    %c0_2 = arith.constant 0 : index
    %c0_3 = arith.constant 0 : index
    %c0_4 = arith.constant 0 : index
    %3 = vector.load %arg2[%c0_2, %c0_3, %c0_4] : memref<9x32x16xbf16, #tpu.memory_space<vmem>>, vector<1x32x16xbf16>
    %4 = vector.shape_cast %3 : vector<1x32x16xbf16> to vector<32x16xbf16>
    %cst_5 = arith.constant dense<0.000000e+00> : vector<32x384xf32>
    %5 = tpu.matmul %4, %2, %cst_5 {dimension_numbers = #tpu.dot_dimension_numbers<[1], [0], [0], [1], [0, 0, 1, 1], [], []>} : vector<32x16xbf16>, vector<16x384xbf16>, vector<32x384xf32> -> vector<32x384xf32>
    %6 = arith.addf %0, %5 : vector<32x384xf32>
    %c0_6 = arith.constant 0 : index
    %c0_7 = arith.constant 0 : index
    %c1 = arith.constant 1 : index
    %7 = vector.load %arg1[%c0_6, %c0_7, %c1] : memref<1x16x512xbf16, #tpu.memory_space<vmem>>, vector<1x16x384xbf16>
    %8 = vector.shape_cast %7 : vector<1x16x384xbf16> to vector<16x384xbf16>
    %c1_8 = arith.constant 1 : index
    %c0_9 = arith.constant 0 : index
    %c0_10 = arith.constant 0 : index
    %9 = vector.load %arg2[%c1_8, %c0_9, %c0_10] : memref<9x32x16xbf16, #tpu.memory_space<vmem>>, vector<1x32x16xbf16>
    %10 = vector.shape_cast %9 : vector<1x32x16xbf16> to vector<32x16xbf16>
    %cst_11 = arith.constant dense<0.000000e+00> : vector<32x384xf32>
    %11 = tpu.matmul %10, %8, %cst_11 {dimension_numbers = #tpu.dot_dimension_numbers<[1], [0], [0], [1], [0, 0, 1, 1], [], []>} : vector<32x16xbf16>, vector<16x384xbf16>, vector<32x384xf32> -> vector<32x384xf32>
    %12 = arith.addf %6, %11 : vector<32x384xf32>
    %c0_12 = arith.constant 0 : index
    %c0_13 = arith.constant 0 : index
    %c2 = arith.constant 2 : index
    %13 = vector.load %arg1[%c0_12, %c0_13, %c2] : memref<1x16x512xbf16, #tpu.memory_space<vmem>>, vector<1x16x384xbf16>
    %14 = vector.shape_cast %13 : vector<1x16x384xbf16> to vector<16x384xbf16>
    %c2_14 = arith.constant 2 : index
    %c0_15 = arith.constant 0 : index
    %c0_16 = arith.constant 0 : index
    %15 = vector.load %arg2[%c2_14, %c0_15, %c0_16] : memref<9x32x16xbf16, #tpu.memory_space<vmem>>, vector<1x32x16xbf16>
    %16 = vector.shape_cast %15 : vector<1x32x16xbf16> to vector<32x16xbf16>
    %cst_17 = arith.constant dense<0.000000e+00> : vector<32x384xf32>
    %17 = tpu.matmul %16, %14, %cst_17 {dimension_numbers = #tpu.dot_dimension_numbers<[1], [0], [0], [1], [0, 0, 1, 1], [], []>} : vector<32x16xbf16>, vector<16x384xbf16>, vector<32x384xf32> -> vector<32x384xf32>
    %18 = arith.addf %12, %17 : vector<32x384xf32>
    %c0_18 = arith.constant 0 : index
    %c0_19 = arith.constant 0 : index
    %c18 = arith.constant 18 : index
    %19 = vector.load %arg1[%c0_18, %c0_19, %c18] : memref<1x16x512xbf16, #tpu.memory_space<vmem>>, vector<1x16x384xbf16>
    %20 = vector.shape_cast %19 : vector<1x16x384xbf16> to vector<16x384xbf16>
    %c3 = arith.constant 3 : index
    %c0_20 = arith.constant 0 : index
    %c0_21 = arith.constant 0 : index
    %21 = vector.load %arg2[%c3, %c0_20, %c0_21] : memref<9x32x16xbf16, #tpu.memory_space<vmem>>, vector<1x32x16xbf16>
    %22 = vector.shape_cast %21 : vector<1x32x16xbf16> to vector<32x16xbf16>
    %cst_22 = arith.constant dense<0.000000e+00> : vector<32x384xf32>
    %23 = tpu.matmul %22, %20, %cst_22 {dimension_numbers = #tpu.dot_dimension_numbers<[1], [0], [0], [1], [0, 0, 1, 1], [], []>} : vector<32x16xbf16>, vector<16x384xbf16>, vector<32x384xf32> -> vector<32x384xf32>
    %24 = arith.addf %18, %23 : vector<32x384xf32>
    %c0_23 = arith.constant 0 : index
    %c0_24 = arith.constant 0 : index
    %c19 = arith.constant 19 : index
    %25 = vector.load %arg1[%c0_23, %c0_24, %c19] : memref<1x16x512xbf16, #tpu.memory_space<vmem>>, vector<1x16x384xbf16>
    %26 = vector.shape_cast %25 : vector<1x16x384xbf16> to vector<16x384xbf16>
    %c4 = arith.constant 4 : index
    %c0_25 = arith.constant 0 : index
    %c0_26 = arith.constant 0 : index
    %27 = vector.load %arg2[%c4, %c0_25, %c0_26] : memref<9x32x16xbf16, #tpu.memory_space<vmem>>, vector<1x32x16xbf16>
    %28 = vector.shape_cast %27 : vector<1x32x16xbf16> to vector<32x16xbf16>
    %cst_27 = arith.constant dense<0.000000e+00> : vector<32x384xf32>
    %29 = tpu.matmul %28, %26, %cst_27 {dimension_numbers = #tpu.dot_dimension_numbers<[1], [0], [0], [1], [0, 0, 1, 1], [], []>} : vector<32x16xbf16>, vector<16x384xbf16>, vector<32x384xf32> -> vector<32x384xf32>
    %30 = arith.addf %24, %29 : vector<32x384xf32>
    %c0_28 = arith.constant 0 : index
    %c0_29 = arith.constant 0 : index
    %c20 = arith.constant 20 : index
    %31 = vector.load %arg1[%c0_28, %c0_29, %c20] : memref<1x16x512xbf16, #tpu.memory_space<vmem>>, vector<1x16x384xbf16>
    %32 = vector.shape_cast %31 : vector<1x16x384xbf16> to vector<16x384xbf16>
    %c5 = arith.constant 5 : index
    %c0_30 = arith.constant 0 : index
    %c0_31 = arith.constant 0 : index
    %33 = vector.load %arg2[%c5, %c0_30, %c0_31] : memref<9x32x16xbf16, #tpu.memory_space<vmem>>, vector<1x32x16xbf16>
    %34 = vector.shape_cast %33 : vector<1x32x16xbf16> to vector<32x16xbf16>
    %cst_32 = arith.constant dense<0.000000e+00> : vector<32x384xf32>
    %35 = tpu.matmul %34, %32, %cst_32 {dimension_numbers = #tpu.dot_dimension_numbers<[1], [0], [0], [1], [0, 0, 1, 1], [], []>} : vector<32x16xbf16>, vector<16x384xbf16>, vector<32x384xf32> -> vector<32x384xf32>
    %36 = arith.addf %30, %35 : vector<32x384xf32>
    %c0_33 = arith.constant 0 : index
    %c0_34 = arith.constant 0 : index
    %c36 = arith.constant 36 : index
    %37 = vector.load %arg1[%c0_33, %c0_34, %c36] : memref<1x16x512xbf16, #tpu.memory_space<vmem>>, vector<1x16x384xbf16>
    %38 = vector.shape_cast %37 : vector<1x16x384xbf16> to vector<16x384xbf16>
    %c6 = arith.constant 6 : index
    %c0_35 = arith.constant 0 : index
    %c0_36 = arith.constant 0 : index
    %39 = vector.load %arg2[%c6, %c0_35, %c0_36] : memref<9x32x16xbf16, #tpu.memory_space<vmem>>, vector<1x32x16xbf16>
    %40 = vector.shape_cast %39 : vector<1x32x16xbf16> to vector<32x16xbf16>
    %cst_37 = arith.constant dense<0.000000e+00> : vector<32x384xf32>
    %41 = tpu.matmul %40, %38, %cst_37 {dimension_numbers = #tpu.dot_dimension_numbers<[1], [0], [0], [1], [0, 0, 1, 1], [], []>} : vector<32x16xbf16>, vector<16x384xbf16>, vector<32x384xf32> -> vector<32x384xf32>
    %42 = arith.addf %36, %41 : vector<32x384xf32>
    %c0_38 = arith.constant 0 : index
    %c0_39 = arith.constant 0 : index
    %c37 = arith.constant 37 : index
    %43 = vector.load %arg1[%c0_38, %c0_39, %c37] : memref<1x16x512xbf16, #tpu.memory_space<vmem>>, vector<1x16x384xbf16>
    %44 = vector.shape_cast %43 : vector<1x16x384xbf16> to vector<16x384xbf16>
    %c7 = arith.constant 7 : index
    %c0_40 = arith.constant 0 : index
    %c0_41 = arith.constant 0 : index
    %45 = vector.load %arg2[%c7, %c0_40, %c0_41] : memref<9x32x16xbf16, #tpu.memory_space<vmem>>, vector<1x32x16xbf16>
    %46 = vector.shape_cast %45 : vector<1x32x16xbf16> to vector<32x16xbf16>
    %cst_42 = arith.constant dense<0.000000e+00> : vector<32x384xf32>
    %47 = tpu.matmul %46, %44, %cst_42 {dimension_numbers = #tpu.dot_dimension_numbers<[1], [0], [0], [1], [0, 0, 1, 1], [], []>} : vector<32x16xbf16>, vector<16x384xbf16>, vector<32x384xf32> -> vector<32x384xf32>
    %48 = arith.addf %42, %47 : vector<32x384xf32>
    %c0_43 = arith.constant 0 : index
    %c0_44 = arith.constant 0 : index
    %c38 = arith.constant 38 : index
    %49 = vector.load %arg1[%c0_43, %c0_44, %c38] : memref<1x16x512xbf16, #tpu.memory_space<vmem>>, vector<1x16x384xbf16>
    %50 = vector.shape_cast %49 : vector<1x16x384xbf16> to vector<16x384xbf16>
    %c8 = arith.constant 8 : index
    %c0_45 = arith.constant 0 : index
    %c0_46 = arith.constant 0 : index
    %51 = vector.load %arg2[%c8, %c0_45, %c0_46] : memref<9x32x16xbf16, #tpu.memory_space<vmem>>, vector<1x32x16xbf16>
    %52 = vector.shape_cast %51 : vector<1x32x16xbf16> to vector<32x16xbf16>
    %cst_47 = arith.constant dense<0.000000e+00> : vector<32x384xf32>
    %53 = tpu.matmul %52, %50, %cst_47 {dimension_numbers = #tpu.dot_dimension_numbers<[1], [0], [0], [1], [0, 0, 1, 1], [], []>} : vector<32x16xbf16>, vector<16x384xbf16>, vector<32x384xf32> -> vector<32x384xf32>
    %54 = arith.addf %48, %53 : vector<32x384xf32>
    %c0_48 = arith.constant 0 : index
    %c0_49 = arith.constant 0 : index
    %55 = vector.load %arg3[%c0_48, %c0_49] : memref<32x1xf32, #tpu.memory_space<vmem>>, vector<32x1xf32>
    %56 = vector.broadcast %55 : vector<32x1xf32> to vector<32x384xf32>
    %57 = arith.addf %54, %56 : vector<32x384xf32>
    %58 = vector.extract_strided_slice %57 {offsets = [0, 0], sizes = [8, 384], strides = [1, 1]} : vector<32x384xf32> to vector<8x384xf32>
    %cst_50 = arith.constant 5.000000e-01 : f32
    %59 = vector.broadcast %cst_50 : f32 to vector<8x384xf32>
    %60 = arith.mulf %59, %58 : vector<8x384xf32>
    %61 = math.tanh %60 : vector<8x384xf32>
    %cst_51 = arith.constant 5.000000e-01 : f32
    %62 = vector.broadcast %cst_51 : f32 to vector<8x384xf32>
    %63 = arith.mulf %62, %61 : vector<8x384xf32>
    %cst_52 = arith.constant 5.000000e-01 : f32
    %64 = vector.broadcast %cst_52 : f32 to vector<8x384xf32>
    %65 = arith.addf %63, %64 : vector<8x384xf32>
    %66 = vector.extract_strided_slice %57 {offsets = [8, 0], sizes = [8, 384], strides = [1, 1]} : vector<32x384xf32> to vector<8x384xf32>
    %cst_53 = arith.constant 5.000000e-01 : f32
    %67 = vector.broadcast %cst_53 : f32 to vector<8x384xf32>
    %68 = arith.mulf %67, %66 : vector<8x384xf32>
    %69 = math.tanh %68 : vector<8x384xf32>
    %cst_54 = arith.constant 5.000000e-01 : f32
    %70 = vector.broadcast %cst_54 : f32 to vector<8x384xf32>
    %71 = arith.mulf %70, %69 : vector<8x384xf32>
    %cst_55 = arith.constant 5.000000e-01 : f32
    %72 = vector.broadcast %cst_55 : f32 to vector<8x384xf32>
    %73 = arith.addf %71, %72 : vector<8x384xf32>
    %74 = vector.extract_strided_slice %57 {offsets = [16, 0], sizes = [8, 384], strides = [1, 1]} : vector<32x384xf32> to vector<8x384xf32>
    %cst_56 = arith.constant 5.000000e-01 : f32
    %75 = vector.broadcast %cst_56 : f32 to vector<8x384xf32>
    %76 = arith.mulf %75, %74 : vector<8x384xf32>
    %77 = math.tanh %76 : vector<8x384xf32>
    %cst_57 = arith.constant 5.000000e-01 : f32
    %78 = vector.broadcast %cst_57 : f32 to vector<8x384xf32>
    %79 = arith.mulf %78, %77 : vector<8x384xf32>
    %cst_58 = arith.constant 5.000000e-01 : f32
    %80 = vector.broadcast %cst_58 : f32 to vector<8x384xf32>
    %81 = arith.addf %79, %80 : vector<8x384xf32>
    %82 = vector.extract_strided_slice %57 {offsets = [24, 0], sizes = [8, 384], strides = [1, 1]} : vector<32x384xf32> to vector<8x384xf32>
    %83 = math.tanh %82 : vector<8x384xf32>
    %c0_59 = arith.constant 0 : index
    %c0_60 = arith.constant 0 : index
    %c0_61 = arith.constant 0 : index
    %84 = vector.load %arg4[%c0_59, %c0_60, %c0_61] : memref<1x8x384xf32, #tpu.memory_space<vmem>>, vector<1x8x384xf32>
    %85 = vector.shape_cast %84 : vector<1x8x384xf32> to vector<8x384xf32>
    %86 = arith.mulf %73, %85 : vector<8x384xf32>
    %87 = arith.mulf %65, %83 : vector<8x384xf32>
    %88 = arith.addf %86, %87 : vector<8x384xf32>
    %89 = math.tanh %88 : vector<8x384xf32>
    %90 = arith.mulf %81, %89 : vector<8x384xf32>
    %c0_62 = arith.constant 0 : index
    %c0_63 = arith.constant 0 : index
    %c0_64 = arith.constant 0 : index
    %91 = vector.load %arg6[%c0_62, %c0_63, %c0_64] : memref<1x8x384xf32, #tpu.memory_space<vmem>>, vector<1x8x384xf32>
    %92 = vector.shape_cast %91 : vector<1x8x384xf32> to vector<8x384xf32>
    %93 = vector.shape_cast %88 : vector<8x384xf32> to vector<1x8x384xf32>
    tpu.vector_store %arg6[%c0_62, %c0_63, %c0_64], %93 {strides = array<i32>} : memref<1x8x384xf32, #tpu.memory_space<vmem>>, vector<1x8x384xf32>,
    %94 = arith.truncf %90 : vector<8x384xf32> to vector<8x384xbf16>
    %c0_65 = arith.constant 0 : index
    %c0_66 = arith.constant 0 : index
    %c0_67 = arith.constant 0 : index
    %95 = vector.load %arg5[%c0_65, %c0_66, %c0_67] : memref<1x8x384xbf16, #tpu.memory_space<vmem>>, vector<1x8x384xbf16>
    %96 = vector.shape_cast %95 : vector<1x8x384xbf16> to vector<8x384xbf16>
    %97 = vector.shape_cast %94 : vector<8x384xbf16> to vector<1x8x384xbf16>
    tpu.vector_store %arg5[%c0_65, %c0_66, %c0_67], %97 {strides = array<i32>} : memref<1x8x384xbf16, #tpu.memory_space<vmem>>, vector<1x8x384xbf16>,
    return
  }
  func.func @transform_0(%arg0: i32) -> (i32, i32, i32) {
    %c0_i32 = arith.constant 0 : i32
    %c0_i32_0 = arith.constant 0 : i32
    %c0_i32_1 = arith.constant 0 : i32
    return %arg0, %c0_i32, %c0_i32_0 : i32, i32, i32
  }
  func.func @transform_1(%arg0: i32) -> (i32, i32, i32) {
    %c0_i32 = arith.constant 0 : i32
    %c0_i32_0 = arith.constant 0 : i32
    %c0_i32_1 = arith.constant 0 : i32
    %c0_i32_2 = arith.constant 0 : i32
    return %c0_i32, %c0_i32_0, %c0_i32_1 : i32, i32, i32
  }
  func.func @transform_2(%arg0: i32) -> (i32, i32) {
    %c0_i32 = arith.constant 0 : i32
    %c0_i32_0 = arith.constant 0 : i32
    %c0_i32_1 = arith.constant 0 : i32
    return %c0_i32, %c0_i32_0 : i32, i32
  }
  func.func @transform_3(%arg0: i32) -> (i32, i32, i32) {
    %c0_i32 = arith.constant 0 : i32
    %c0_i32_0 = arith.constant 0 : i32
    %c0_i32_1 = arith.constant 0 : i32
    return %arg0, %c0_i32, %c0_i32_0 : i32, i32, i32
  }
  func.func @transform_4(%arg0: i32) -> (i32, i32, i32) {
    %c0_i32 = arith.constant 0 : i32
    %c0_i32_0 = arith.constant 0 : i32
    %c0_i32_1 = arith.constant 0 : i32
    return %arg0, %c0_i32, %c0_i32_0 : i32, i32, i32
  }
  func.func @transform_5(%arg0: i32) -> (i32, i32, i32) {
    %c0_i32 = arith.constant 0 : i32
    %c0_i32_0 = arith.constant 0 : i32
    %c0_i32_1 = arith.constant 0 : i32
    return %arg0, %c0_i32, %c0_i32_0 : i32, i32, i32
  }
}

</mosaic_0001>

<bundles_post_ra>
// kernel: tpu_custom_call.1
= control target key start
LH: loop header
LB: loop body
LE: loop exit
PB: predicated region body
PF: predicated region fallthrough
CT: control target
= control target key end

     0   :  { %11 = vsyncpa [#allocation3], 0  ;;  %s2730_s0 = inlined_call_operand.vmem [shape: bf16[2,16,512], index: 0, kind: input, shape index: {}]   ;;  %s2731_s1 = inlined_call_operand.vmem [shape: bf16[9,32,16], index: 1, kind: input, shape index: {}]   ;;  %s2732_s2 = inlined_call_operand.vmem [shape: f32[32,1], index: 2, kind: input, shape index: {}]   ;;  %s2733_s3 = inlined_call_operand.vmem [shape: f32[2,8,384], index: 3, kind: input, shape index: {}]   ;;  %s2734_s4 = inlined_call_operand.hbm [shape: bf16[2,8,384], index: 4, kind: output, shape index: {0}]   ;;  %s2735_s5 = inlined_call_operand.hbm [shape: f32[2,8,384], index: 5, kind: output, shape index: {1}]  }
   0x1   :  { %13 = vsyncpa [#allocation3 + $0x1], 0 }
   0x2   :  { %14 = vsyncpa [#allocation5], 0 }
   0x3   :  { %16 = vsyncpa [#allocation5 + $0x1], 0  ;;  %s2392_s18 = smov 0   ;;  %s2394_s19 = smov 0  }
   0x4   :  { %s2396_s20 = smov 0   ;;  %s2398_s21 = smov 0  }
   0x5 LB: > { %s2413_s22 = sadd.s32 4294967295, %s2349_s21   ;;  %s1854_s23 = sadd.s32 4294967294, %s2349_s21   ;;  %s2349_s21 = sphi %s2398_s21, %s2741_s21   ;;  %s2345_s20 = sphi %s2396_s20, %s2740_s20   ;;  %s2341_s19 = sphi %s2394_s19, %s2739_s19   ;;  %s2337_s18 = sphi %s2392_s18, %s2738_s18  }
   0x6   : > { %s2417_s24 = sadd.s32 1, %s2349_s21   ;;  %s123_s25 = sadd.s32 1, %s2345_s20 }
   0x7   : > { %s120_s26 = ssub.s32 %s2349_s21, %s2417_s24  ;;  %p133_p0 = scmp.ne.s32.totalorder %s2345_s20, %s2341_s19 }
   0x8   : > { %p121_p1 = scmp.eq.s32.totalorder %s120_s26, 0  ;;  %p134_p2 = scmp.eq.s32.totalorder %s2413_s22, 1 }
   0x9   : > { %p139_p3 = scmp.ne.s32.totalorder %s2341_s19, %s2337_s18  ;;  %p140_p4 = scmp.eq.s32.totalorder %s1854_s23, 1 }
   0xa   : > { %s2428_s27 = scalar_select %p121_p1, %s2345_s20, %s123_s25  }
   0xb   : > { %p2430_p5 = por %p134_p2, %p133_p0  ;;  %p2434_p6 = por %p140_p4, %p139_p3 }
   0xc   : > { %p1857_p7 = scmp.ge.s32.totalorder %s2349_s21, 1  ;;  %p206_p8 = scmp.lt.s32.totalorder %s2349_s21, 3 }
   0xe   : > { %p207_p9 = pnand %p1857_p7, %p206_p8 }
   0xf   : > { %p244_p10 = scmp.lt.s32.totalorder (!%p207_p9), %s2413_s22, 1  ;;  %v2351_v0 = vmov (!%p207_p9), 0   ;;  %s2352_s10 = smov (!%p207_p9), 127   ;;  %vm306_vm0 = vcmask (!%p207_p9), 1039360   ;;  %v2206_v11 = vld [vmem:[%s2731_s1 + $0x10] sm:$0xff] (!%p207_p9)   ;;  %v1606_v12 = vld [vmem:[%s2732_s2] sm:$0xff] (!%p207_p9) }
  0x10   : > { %210 = sbr.rel (%p207_p9) target bundleno = 553 (0x229), region = 36  ;;  %352 = vmatprep.mubr.bf16.mxu1 (!%p207_p9), %v2351_v0  ;;  %624 = vmatprep.mubr.bf16.mxu0 (!%p207_p9), %v2351_v0  ;;  %s2353_s11 = smov (!%p207_p9), 126   ;;  %v1607_v13 = vld [vmem:[%s2732_s2 + $0x8] sm:$0xff] (!%p207_p9)  ;;  %vm313_vm1 = vcmask (!%p207_p9), 130048   ;;  %vm579_vm2 = vcmask (!%p207_p9), 1031168   ;;  %v1608_v18 = vld [vmem:[%s2732_s2 + $0x10] sm:$0xff] (!%p207_p9) }
  0x11   : > { %2198 = vset.pattern.permute.xlu0 (!%p207_p9), %v2351_v0  ;;  %2199 = vset.pattern.permute.xlu1 (!%p207_p9), %v2351_v0  ;;  %s2354_s12 = smov (!%p207_p9), 110   ;;  %s2355_s13 = smov (!%p207_p9), 109   ;;  %v1609_v19 = vld [vmem:[%s2732_s2 + $0x18] sm:$0xff] (!%p207_p9)  ;;  %v2501_v22 = vld [vmem:[%s2731_s1 + $0x20] sm:$0xff] (!%p207_p9)   ;;  %vm729_vm3 = vcmask (!%p207_p9), 900096   ;;  %v2516_v30 = vld [vmem:[%s2731_s1 + $0x28] sm:$0xff] (!%p207_p9)  }
  0x12   : > { %s2356_s14 = smov (!%p207_p9), 108   ;;  %s2357_s15 = smov (!%p207_p9), 92   ;;  %v2208_v24 = vld [vmem:[%s2731_s1 + $0x18] sm:$0xff] (!%p207_p9)   ;;  %vm879_vm4 = vcmask (!%p207_p9), 891904   ;;  %v2211_v37 = vld [vmem:[%s2731_s1 + $0x30] sm:$0xff] (!%p207_p9)   ;;  %v2212_v38 = vld [vmem:[%s2731_s1] sm:$0xff] (!%p207_p9)  }
  0x13   : > { %s2358_s16 = smov (!%p207_p9), 91   ;;  %s2359_s17 = smov (!%p207_p9), 90   ;;  %vm1029_vm5 = vcmask (!%p207_p9), 883712   ;;  %v2213_v44 = vld [vmem:[%s2731_s1 + $0x38] sm:$0xff] (!%p207_p9)   ;;  %v2214_v46 = vld [vmem:[%s2731_s1 + $0x8] sm:$0xff] (!%p207_p9)   ;;  %v2215_v49 = vld [vmem:[%s2731_s1 + $0x40] sm:$0xff] (!%p207_p9)  }
  0x14   : > { %vm1179_vm6 = vcmask (!%p207_p9), 752640   ;;  %v2216_v55 = vld [vmem:[%s2731_s1 + $0x48] sm:$0xff] (!%p207_p9)   ;;  %v2217_v59 = vld [vmem:[%s2731_s1 + $0x50] sm:$0xff] (!%p207_p9)   ;;  %vm1329_vm7 = vcmask (!%p207_p9), 744448   ;;  %vm1479_vm8 = vcmask (!%p207_p9), 736256  }
  0x17   : > { %s2442_s30 = scalar_select %p244_p10, %s2413_s22, 1 }
  0x19   : > { %s1960_s6 = sshll.u32 %s2442_s30, 5  ;;  %s2142_s23 = smul.u32 24, %s2442_s30 }
  0x1a   : > { %s2452_s9 = scalar_lea.vmem %s2730_s0, %s1960_s6 }
  0x1b   : > { %v2455_v1 = vld [vmem:[%s2452_s9 + $0x4] ss:$16 sps:$4 sm:$0xff]   ;;  %v2458_v2 = vld [vmem:[%s2452_s9] ss:$16 sps:$4 sm:$0xff]   ;;  %v2203_v3 = vld [vmem:[%s2452_s9 + $0x8] ss:$16 sps:$4 sm:$0xff]   ;;  %s2632_s6 = scalar_lea.vmem %s2733_s3, %s2142_s23 }
  0x1c   : > { %300 = vrot.lane.b32.xlu0 %v2455_v1, %s2352_s10  ;;  %v2205_v4 = vld [vmem:[%s2452_s9 + $0xc] ss:$16 sps:$4 sm:$0xff]   ;;  %298 = vrot.lane.b32.xlu1 %v2458_v2, %s2352_s10  ;;  %v2210_v33 = vld [vmem:[%s2452_s9 + $0x8] ss:$16 sps:$4 sm:$0xff]   ;;  %s2635_s9 = sand.u32 1, %s2341_s19   ;;  %s2360_s23 = smov [#allocation4]  }
  0x1d   : > { %s2141_s30 = smul.u32 24, %s2635_s9  ;;  %s2259_s25 = sshll.u32 %s2360_s23, 4  ;;  %s2260_s25 = int_to_ptr.vmem [resolvable:$false] %s2259_s25 }
  0x1e   : > { %s2140_s8 = smul.u32 12, %s2635_s9  ;;  %s2261_s26 = scalar_lea.vmem %s2260_s25, 768 }
  0x1f   : > { %s2640_s7 = scalar_lea.vmem [#allocation4], %s2141_s30 }
  0x20   : > { %302 = vrot.lane.b32.xlu0 %v2203_v3, %s2352_s10  ;;  %304 = vrot.lane.b32.xlu1 %v2205_v4, %s2352_s10  ;;  %s2144_s10 = smul.u32 384, %s2413_s22 }
  0x24   : > { %573 = vrot.lane.b32.xlu0 %v2455_v1, %s2353_s11  ;;  %575 = vrot.lane.b32.xlu1 %v2203_v3, %s2353_s11 }
  0x28   : > { %571 = vrot.lane.b32.xlu0 %v2458_v2, %s2353_s11  ;;  %723 = vrot.lane.b32.xlu1 %v2455_v1, %s2354_s12 }
  0x2c   : > { %725 = vrot.lane.b32.xlu0 %v2203_v3, %s2354_s12  ;;  %721 = vrot.lane.b32.xlu1 %v2458_v2, %s2354_s12 }
  0x30   : > { %577 = vrot.lane.b32.xlu0 %v2205_v4, %s2353_s11  ;;  %873 = vrot.lane.b32.xlu1 %v2455_v1, %s2355_s13  ;;  %s1751_s11 = sshll.u32 %s2640_s7, 4  ;;  %s2653_s11 = int_to_ptr.vmem [resolvable:$true] %s1751_s11 }
  0x31   : > { %p2262_p0 = scmp.lt.s32.totalorder %s2653_s11, %s2260_s25 }
  0x34   : > { %875 = vrot.lane.b32.xlu0 %v2203_v3, %s2355_s13  ;;  %871 = vrot.lane.b32.xlu1 %v2458_v2, %s2355_s13 }
  0x38   : > { %727 = vrot.lane.b32.xlu0 %v2205_v4, %s2354_s12  ;;  %1023 = vrot.lane.b32.xlu1 %v2455_v1, %s2356_s14 }
  0x3c   : > { %1025 = vrot.lane.b32.xlu0 %v2203_v3, %s2356_s14  ;;  %1021 = vrot.lane.b32.xlu1 %v2458_v2, %s2356_s14 }
  0x40   : > { %877 = vrot.lane.b32.xlu0 %v2205_v4, %s2355_s13  ;;  %1027 = vrot.lane.b32.xlu1 %v2205_v4, %s2356_s14  ;;  %s2651_s14 = scalar_lea.hbm %s2735_s5, %s2144_s10 }
  0x44   : > { %1173 = vrot.lane.b32.xlu0 %v2455_v1, %s2357_s15  ;;  %1175 = vrot.lane.b32.xlu1 %v2203_v3, %s2357_s15 }
  0x48   : > { %1171 = vrot.lane.b32.xlu0 %v2458_v2, %s2357_s15  ;;  %1177 = vrot.lane.b32.xlu1 %v2205_v4, %s2357_s15  ;;  %s2655_s15 = scalar_lea.vmem [#allocation2], %s2140_s8 }
  0x4c   : > { %1323 = vrot.lane.b32.xlu0 %v2455_v1, %s2358_s16  ;;  %1325 = vrot.lane.b32.xlu1 %v2203_v3, %s2358_s16 }
  0x50   : > { %1321 = vrot.lane.b32.xlu0 %v2458_v2, %s2358_s16  ;;  %1327 = vrot.lane.b32.xlu1 %v2205_v4, %s2358_s16  ;;  %s1723_s16 = scalar_lea.sflag [#allocation5], %s2635_s9 }
  0x54   : > { %1473 = vrot.lane.b32.xlu0 %v2455_v1, %s2359_s17  ;;  %1475 = vrot.lane.b32.xlu1 %v2203_v3, %s2359_s17 }
  0x58   : > { %1471 = vrot.lane.b32.xlu0 %v2458_v2, %s2359_s17  ;;  %1477 = vrot.lane.b32.xlu1 %v2205_v4, %s2359_s17  ;;  %s2255_s17 = scalar_lea.vmem %s2653_s11, 384 }
  0x59   : > { %p2256_p11 = scmp.ne.s32.totalorder %s2653_s11, %s2255_s17  ;;  %p2263_p1 = scmp.lt.s32.totalorder %s2261_s26, %s2255_s17 }
  0x5b   : > { %p2257_p12 = pnand %p2256_p11, %p2430_p5  ;;  %p2264_p2 = por %p2263_p1, %p2262_p0 }
  0x5c   : > { %1612 = vperm.xlu0 %2198, %v1606_v12   ;;  %1617 = vperm.xlu1 %2199, %v1607_v13   ;;  %v2221_v12 = vld [vmem:[%s2731_s1 + $0x70] sm:$0xff]  }
  0x5d   : > { %p2258_p13 = pneg %p2257_p12 }
  0x5f   : > { %p2265_p3 = pnand %p2264_p2, %p2258_p13 }
  0x60   : > { %1622 = vperm.xlu0 %2198, %v1608_v18   ;;  %1627 = vperm.xlu1 %2199, %v1609_v19   ;;  %v2223_v18 = vld [vmem:[%s2731_s1 + $0x80] sm:$0xff]  }
  0x8e   : > { %v301_v5 = vpop.permute.xlu0 %300  ;;  %v299_v6 = vpop.permute.xlu1 %298 }
  0x8f   : > { %v307_v10 = vsel %vm306_vm0, %v299_v6, %v301_v5 }
  0x92   : > { %v303_v7 = vpop.permute.xlu0 %302  ;;  %v305_v8 = vpop.permute.xlu1 %304 }
  0x93   : > { %v308_v9 = vsel %vm306_vm0, %v301_v5, %v303_v7  ;;  %v309_v14 = vsel %vm306_vm0, %v303_v7, %v305_v8  ;;  %v2219_v5 = vld [vmem:[%s2731_s1 + $0x60] sm:$0xff]  }
  0x94   : > { %320 = vmatprep.subr.bf16.mxu1 %v308_v9 }
  0x95   : > { %321 = vmatpush1.bf16.msra.mxu1 %v307_v10 }
  0x96   : > { %v574_v15 = vpop.permute.xlu0 %573  ;;  %1990 = vmatprep.subr.bf16.mxu1 %v309_v14  ;;  %v576_v16 = vpop.permute.xlu1 %575 }
  0x97   : > { %v581_v17 = vsel %vm579_vm2, %v574_v15, %v576_v16 }
  0x98   : > { %1871 = vmatmul.mubr.msk.bf16.vlgmr.msra.gmra.mrb[0].mxu1 %vm313_vm1, %v2206_v11  ;;  %592 = vmatprep.subr.bf16.mxu0 %v581_v17 }
  0x99   : > { %1991 = vmatpush3.bf16.msra.mxu1 %v309_v14  ;;  %362 = vmatprep.mubr.bf16.mxu1 %v2351_v0 }
  0x9a   : > { %v572_v20 = vpop.permute.xlu0 %571  ;;  %454 = vmatprep.subr.bf16.mxu1 %v2455_v1  ;;  %v724_v23 = vpop.permute.xlu1 %723  ;;  %v2218_v1 = vld [vmem:[%s2731_s1 + $0x58] sm:$0xff]  }
  0x9b   : > { %v580_v21 = vsel %vm579_vm2, %v572_v20, %v574_v15  ;;  %v2224_v20 = vld [vmem:[%s2731_s1 + $0x88] sm:$0xff]  }
  0x9c   : > { %593 = vmatpush1.bf16.msra.mxu0 %v580_v21 }
  0x9e   : > { %v726_v25 = vpop.permute.xlu0 %725  ;;  %v722_v26 = vpop.permute.xlu1 %721 }
  0x9f   : > { %1890 = vmatmul.mubr.msk.bf16.vlgmr.msra.gmra.mrb[0].mxu0 %vm313_vm1, %v2501_v22  ;;  %v731_v27 = vsel %vm729_vm3, %v724_v23, %v726_v25  ;;  %v730_v28 = vsel %vm729_vm3, %v722_v26, %v724_v23 }
  0xa0   : > { %1872 = vmatmul.mubr.msk.bf16.gmra.mrb[4].mxu1 %vm313_vm1, %v2208_v24  ;;  %634 = vmatprep.mubr.bf16.mxu0 %v2351_v0 }
  0xa1   : > { %1992 = vmatprep.mubr.msk.bf16.mxu1 %vm313_vm1, %v2206_v11  ;;  %742 = vmatprep.subr.bf16.mxu0 %v731_v27  ;;  %v2220_v11 = vld [vmem:[%s2731_s1 + $0x68] sm:$0xff]  }
  0xa2   : > { %v578_v29 = vpop.permute.xlu0 %577  ;;  %743 = vmatpush1.bf16.msra.mxu0 %v730_v28  ;;  %v874_v31 = vpop.permute.xlu1 %873 }
  0xa3   : > { %v582_v43 = vsel %vm579_vm2, %v576_v16, %v578_v29  ;;  %v2222_v16 = vld [vmem:[%s2731_s1 + $0x78] sm:$0xff]  }
  0xa6   : > { %v876_v32 = vpop.permute.xlu0 %875  ;;  %v872_v35 = vpop.permute.xlu1 %871 }
  0xa7   : > { %1891 = vmatmul.mubr.msk.bf16.gmra.mrb[4].mxu0 %vm313_vm1, %v2516_v30  ;;  %v881_v34 = vsel %vm879_vm4, %v874_v31, %v876_v32  ;;  %v880_v41 = vsel %vm879_vm4, %v872_v35, %v874_v31 }
  0xa8   : > { %1993 = vmatmul.mubr.msk.bf16.vlgmr.msra.gmra.mrb[8].mxu1 %vm313_vm1, %v2208_v24  ;;  %774 = vmatprep.mubr.bf16.mxu0 %v2351_v0 }
  0xa9   : > { %455 = vmatpush1.bf16.msra.mxu1 %v2458_v2  ;;  %486 = vmatprep.mubr.bf16.mxu1 %v2351_v0 }
  0xaa   : > { %1996 = vmatprep.subr.bf16.mxu1 %v2210_v33  ;;  %892 = vmatprep.subr.bf16.mxu0 %v881_v34  ;;  %v728_v36 = vpop.permute.xlu0 %727  ;;  %v1024_v39 = vpop.permute.xlu1 %1023 }
  0xab   : > { %v732_v54 = vsel %vm729_vm3, %v726_v25, %v728_v36 }
  0xae   : > { %v1026_v40 = vpop.permute.xlu0 %1025  ;;  %v1022_v45 = vpop.permute.xlu1 %1021 }
  0xaf   : > { %1900 = vmatmul.mubr.msk.bf16.vlgmr.msra.gmra.mrb[0].mxu0 %vm313_vm1, %v2211_v37  ;;  %v1031_v42 = vsel %vm1029_vm5, %v1024_v39, %v1026_v40  ;;  %v1030_v51 = vsel %vm1029_vm5, %v1022_v45, %v1024_v39 }
  0xb0   : > { %1880 = vmatmul.mubr.msk.bf16.vlgmr.msra.gmra.mrb[0].mxu1 %vm313_vm1, %v2212_v38  ;;  %784 = vmatprep.mubr.bf16.mxu0 %v2351_v0 }
  0xb1   : > { %1997 = vmatpush3.bf16.msra.mxu1 %v2210_v33  ;;  %496 = vmatprep.mubr.bf16.mxu1 %v2351_v0 }
  0xb2   : > { %2002 = vmatprep.subr.bf16.mxu1 %v582_v43  ;;  %893 = vmatpush1.bf16.msra.mxu0 %v880_v41  ;;  %v1028_v47 = vpop.permute.xlu1 %1027  ;;  %v878_v48 = vpop.permute.xlu0 %877 }
  0xb3   : > { %1042 = vmatprep.subr.bf16.mxu0 %v1031_v42  ;;  %v882_v58 = vsel %vm879_vm4, %v876_v32, %v878_v48  ;;  %v1032_v3 = vsel %vm1029_vm5, %v1026_v40, %v1028_v47 }
  0xb6   : > { %v1176_v50 = vpop.permute.xlu1 %1175  ;;  %v1174_v52 = vpop.permute.xlu0 %1173 }
  0xb7   : > { %1901 = vmatmul.mubr.msk.bf16.gmra.mrb[4].mxu0 %vm313_vm1, %v2213_v44  ;;  %v1181_v53 = vsel %vm1179_vm6, %v1174_v52, %v1176_v50 }
  0xb8   : > { %1881 = vmatmul.mubr.msk.bf16.gmra.mrb[4].mxu1 %vm313_vm1, %v2214_v46  ;;  %924 = vmatprep.mubr.bf16.mxu0 %v2351_v0 }
  0xb9   : > { %1998 = vmatprep.mubr.msk.bf16.mxu1 %vm313_vm1, %v2212_v38 }
  0xba   : > { %v1178_v56 = vpop.permute.xlu1 %1177  ;;  %v1172_v57 = vpop.permute.xlu0 %1171 }
  0xbb   : > { %v1180_v61 = vsel %vm1179_vm6, %v1172_v57, %v1174_v52  ;;  %v1182_v10 = vsel %vm1179_vm6, %v1176_v50, %v1178_v56 }
  0xbe   : > { %v1326_v60 = vpop.permute.xlu1 %1325  ;;  %v1324_v62 = vpop.permute.xlu0 %1323 }
  0xbf   : > { %1910 = vmatmul.mubr.msk.bf16.vlgmr.msra.gmra.mrb[0].mxu0 %vm313_vm1, %v2215_v49  ;;  %v1331_v63 = vsel %vm1329_vm7, %v1324_v62, %v1326_v60 }
  0xc0   : > { %1999 = vmatmul.mubr.msk.bf16.vlgmr.msra.gmra.mrb[8].mxu1 %vm313_vm1, %v2214_v46  ;;  %934 = vmatprep.mubr.bf16.mxu0 %v2351_v0 }
  0xc1   : > { %2003 = vmatpush3.bf16.msra.mxu1 %v582_v43  ;;  %2004 = vmatprep.mubr.msk.bf16.mxu1 %vm313_vm1, %v2501_v22 }
  0xc2   : > { %2008 = vmatprep.subr.bf16.mxu1 %v732_v54  ;;  %1043 = vmatpush1.bf16.msra.mxu0 %v1030_v51  ;;  %v1328_v2 = vpop.permute.xlu1 %1327  ;;  %v1322_v4 = vpop.permute.xlu0 %1321 }
  0xc3   : > { %1192 = vmatprep.subr.bf16.mxu0 %v1181_v53  ;;  %v1330_v7 = vsel %vm1329_vm7, %v1322_v4, %v1324_v62  ;;  %v1332_v14 = vsel %vm1329_vm7, %v1326_v60, %v1328_v2 }
  0xc6   : > { %v1476_v6 = vpop.permute.xlu1 %1475  ;;  %v1474_v8 = vpop.permute.xlu0 %1473 }
  0xc7   : > { %1911 = vmatmul.mubr.msk.bf16.gmra.mrb[4].mxu0 %vm313_vm1, %v2216_v55  ;;  %v1481_v9 = vsel %vm1479_vm8, %v1474_v8, %v1476_v6 }
  0xc8   : > { %1074 = vmatprep.mubr.bf16.mxu0 %v2351_v0 }
  0xca   : > { %v1472_v13 = vpop.permute.xlu0 %1471  ;;  %v1478_v17 = vpop.permute.xlu1 %1477 }
  0xcb   : > { %v1480_v15 = vsel %vm1479_vm8, %v1472_v13, %v1474_v8  ;;  %v1482_v19 = vsel %vm1479_vm8, %v1476_v6, %v1478_v17  ;;  %v1681_v13 = vld [vmem:[%s2632_s6] sm:$0xff] }
  0xcc   : > { %2005 = vmatmul.mubr.msk.bf16.vlgmr.msra.gmra.mrb[8].mxu1 %vm313_vm1, %v2516_v30 }
  0xcd   : > { %2009 = vmatpush3.bf16.msra.mxu1 %v732_v54  ;;  %2010 = vmatprep.mubr.msk.bf16.mxu1 %vm313_vm1, %v2211_v37 }
  0xce   : > { %2014 = vmatprep.subr.bf16.mxu1 %v882_v58 }
  0xcf   : > { %1920 = vmatmul.mubr.msk.bf16.vlgmr.msra.gmra.mrb[0].mxu0 %vm313_vm1, %v2217_v59 }
  0xd0   : > { %1084 = vmatprep.mubr.bf16.mxu0 %v2351_v0  ;;  %1193 = vmatpush1.bf16.msra.mxu0 %v1180_v61 }
  0xd1   : > { %1342 = vmatprep.subr.bf16.mxu0 %v1331_v63 }
  0xd7   : > { %1921 = vmatmul.mubr.msk.bf16.gmra.mrb[4].mxu0 %vm313_vm1, %v2218_v1 }
  0xd8   : > { %2011 = vmatmul.mubr.msk.bf16.vlgmr.msra.gmra.mrb[8].mxu1 %vm313_vm1, %v2213_v44  ;;  %1224 = vmatprep.mubr.bf16.mxu0 %v2351_v0 }
  0xd9   : > { %2015 = vmatpush3.bf16.msra.mxu1 %v882_v58  ;;  %2016 = vmatprep.mubr.msk.bf16.mxu1 %vm313_vm1, %v2215_v49 }
  0xda   : > { %2020 = vmatprep.subr.bf16.mxu1 %v1032_v3 }
  0xdb   : > { %v1613_v29 = vpop.permute.xlu0 %1612  ;;  %v1618_v34 = vpop.permute.xlu1 %1617 }
  0xdf   : > { %1930 = vmatmul.mubr.msk.bf16.vlgmr.msra.gmra.mrb[0].mxu0 %vm313_vm1, %v2219_v5  ;;  %v1628_v51 = vpop.permute.xlu1 %1627 }
  0xe0   : > { %1234 = vmatprep.mubr.bf16.mxu0 %v2351_v0  ;;  %1343 = vmatpush1.bf16.msra.mxu0 %v1330_v7 }
  0xe1   : > { %1492 = vmatprep.subr.bf16.mxu0 %v1481_v9 }
  0xe4   : > { %2017 = vmatmul.mubr.msk.bf16.vlgmr.msra.gmra.mrb[8].mxu1 %vm313_vm1, %v2216_v55  ;;  %v1623_v55 = vpop.permute.xlu0 %1622 }
  0xe5   : > { %2021 = vmatpush3.bf16.msra.mxu1 %v1032_v3  ;;  %2022 = vmatprep.mubr.msk.bf16.mxu1 %vm313_vm1, %v2217_v59 }
  0xe6   : > { %2026 = vmatprep.subr.bf16.mxu1 %v1182_v10 }
  0xe7   : > { %1931 = vmatmul.mubr.msk.bf16.gmra.mrb[4].mxu0 %vm313_vm1, %v2220_v11 }
  0xe8   : > { %1374 = vmatprep.mubr.bf16.mxu0 %v2351_v0 }
  0xef   : > { %1940 = vmatmul.mubr.msk.bf16.vlgmr.msra.gmra.mrb[0].mxu0 %vm313_vm1, %v2221_v12 }
  0xf0   : > { %2023 = vmatmul.mubr.msk.bf16.vlgmr.msra.gmra.mrb[8].mxu1 %vm313_vm1, %v2218_v1  ;;  %1384 = vmatprep.mubr.bf16.mxu0 %v2351_v0 }
  0xf1   : > { %2027 = vmatpush3.bf16.msra.mxu1 %v1182_v10  ;;  %2028 = vmatprep.mubr.msk.bf16.mxu1 %vm313_vm1, %v2219_v5 }
  0xf2   : > { %2032 = vmatprep.subr.bf16.mxu1 %v1332_v14  ;;  %1493 = vmatpush1.bf16.msra.mxu0 %v1480_v15 }
  0xf7   : > { %1941 = vmatmul.mubr.msk.bf16.gmra.mrb[4].mxu0 %vm313_vm1, %v2222_v16 }
  0xf8   : > { %1524 = vmatprep.mubr.bf16.mxu0 %v2351_v0 }
  0xfc   : > { %2029 = vmatmul.mubr.msk.bf16.vlgmr.msra.gmra.mrb[8].mxu1 %vm313_vm1, %v2220_v11 }
  0xfd   : > { %2033 = vmatpush3.bf16.msra.mxu1 %v1332_v14  ;;  %2034 = vmatprep.mubr.msk.bf16.mxu1 %vm313_vm1, %v2221_v12 }
  0xfe   : > { %2038 = vmatprep.subr.bf16.mxu1 %v1482_v19 }
  0xff   : > { %1950 = vmatmul.mubr.msk.bf16.vlgmr.msra.gmra.mrb[0].mxu0 %vm313_vm1, %v2223_v18 }
 0x100   : > { %1534 = vmatprep.mubr.bf16.mxu0 %v2351_v0 }
 0x107   : > { %1951 = vmatmul.mubr.msk.bf16.gmra.mrb[4].mxu0 %vm313_vm1, %v2224_v20 }
 0x108   : > { %2035 = vmatmul.mubr.msk.bf16.vlgmr.msra.gmra.mrb[8].mxu1 %vm313_vm1, %v2222_v16 }
 0x109   : > { %2039 = vmatpush3.bf16.msra.mxu1 %v1482_v19  ;;  %2040 = vmatprep.mubr.msk.bf16.mxu1 %vm313_vm1, %v2223_v18  ;;  %v1682_v18 = vld [vmem:[%s2632_s6 + $0x8] sm:$0xff] }
 0x114   : > { %2041 = vmatmul.mubr.msk.bf16.vlgmr.msra.gmra.mrb[8].mxu1 %vm313_vm1, %v2224_v20 }
 0x183   : > { %v488_v21 = vpop.f32.mrb[0].mxu1 }
 0x184   : > { %v490_v22 = vpop.f32.mrb[1].mxu1 }
 0x185   : > { %v492_v23 = vpop.f32.mrb[2].mxu1 }
 0x186   : > { %v494_v24 = vpop.f32.mrb[3].mxu1 }
 0x18b   : > { %v498_v25 = vpop.f32.mrb[4].mxu1 }
 0x18c   : > { %v500_v26 = vpop.f32.mrb[5].mxu1 }
 0x18d   : > { %v502_v0 = vpop.f32.mrb[6].mxu1 }
 0x18e   : > { %v504_v27 = vpop.f32.mrb[7].mxu1 }
 0x1d2   : > { %v1526_v28 = vpop.f32.mrb[0].mxu0 }
 0x1d3   : > { %v2044_v30 = vadd.f32 %v1526_v28, %v488_v21  ;;  %v1528_v31 = vpop.f32.mrb[1].mxu0 }
 0x1d4   : > { %v2045_v32 = vadd.f32 %v1528_v31, %v490_v22  ;;  %v1530_v33 = vpop.f32.mrb[2].mxu0 }
 0x1d5   : > { %v1630_v35 = vadd.f32 %v2044_v30, %v1613_v29  ;;  %v2046_v36 = vadd.f32 %v1530_v33, %v492_v23  ;;  %v1532_v37 = vpop.f32.mrb[3].mxu0 }
 0x1d6   : > { %v1631_v38 = vadd.f32 %v2045_v32, %v1613_v29  ;;  %v2047_v39 = vadd.f32 %v1532_v37, %v494_v24 }
 0x1d7   : > { %v1642_v40 = vmul.f32 0.5, %v1630_v35  ;;  %v1633_v41 = vadd.f32 %v2046_v36, %v1618_v34 }
 0x1d8   : > { %v1643_v42 = vmul.f32 0.5, %v1631_v38  ;;  %v1634_v43 = vadd.f32 %v2047_v39, %v1618_v34 }
 0x1d9   : > { %2225 = vtanh.f32 %v1642_v40  ;;  %v1654_v44 = vmul.f32 0.5, %v1633_v41 }
 0x1da   : > { %2227 = vtanh.f32 %v1643_v42  ;;  %v1655_v45 = vmul.f32 0.5, %v1634_v43  ;;  %v1536_v46 = vpop.f32.mrb[4].mxu0  ;;  %v1683_v42 = vld [vmem:[%s2632_s6 + $0x10] sm:$0xff] }
 0x1db   : > { %2229 = vtanh.f32 %v1654_v44  ;;  %v2048_v47 = vadd.f32 %v1536_v46, %v498_v25  ;;  %v1538_v48 = vpop.f32.mrb[5].mxu0 }
 0x1dc   : > { %2231 = vtanh.f32 %v1655_v45  ;;  %v2049_v49 = vadd.f32 %v1538_v48, %v500_v26  ;;  %v1540_v50 = vpop.f32.mrb[6].mxu0 }
 0x1dd   : > { %v2050_v52 = vadd.f32 %v1540_v50, %v502_v0  ;;  %v1542_v53 = vpop.f32.mrb[7].mxu0  ;;  %v1636_v58 = vadd.f32 %v2048_v47, %v1623_v55 }
 0x1de   : > { %v2051_v54 = vadd.f32 %v1542_v53, %v504_v27  ;;  %v1637_v60 = vadd.f32 %v2049_v49, %v1623_v55 }
 0x1df   : > { %v1639_v56 = vadd.f32 %v2050_v52, %v1628_v51  ;;  %v1666_v2 = vmul.f32 0.5, %v1636_v58 }
 0x1e0   : > { %v1640_v57 = vadd.f32 %v2051_v54, %v1628_v51  ;;  %v1667_v4 = vmul.f32 0.5, %v1637_v60 }
 0x1e1   : > { %2233 = vtanh.f32 %v1639_v56 }
 0x1e2   : > { %2235 = vtanh.f32 %v1640_v57 }
 0x1e3   : > { %v2226_v59 = vpop.eup %2225  ;;  %2237 = vtanh.f32 %v1666_v2 }
 0x1e4   : > { %v2228_v61 = vpop.eup %2227  ;;  %v1648_v6 = vmul.f32 0.5, %v2226_v59  ;;  %2239 = vtanh.f32 %v1667_v4 }
 0x1e5   : > { %v2230_v62 = vpop.eup %2229  ;;  %v1649_v8 = vmul.f32 0.5, %v2228_v61 }
 0x1e6   : > { %v2232_v63 = vpop.eup %2231  ;;  %v1660_v1 = vmul.f32 0.5, %v2230_v62  ;;  %v1651_v17 = vadd.f32 0.5, %v1648_v6 }
 0x1e7   : > { %v1661_v3 = vmul.f32 0.5, %v2232_v63  ;;  %v2042_v5 = vpop.f32.mrb[8].mxu1  ;;  %v1652_v20 = vadd.f32 0.5, %v1649_v8 }
 0x1e8   : > { %v1579_v7 = vpop.f32.mrb[9].mxu1  ;;  %v1663_v11 = vadd.f32 0.5, %v1660_v1 }
 0x1e9   : > { %v1632_v9 = vadd.f32 %v1613_v29, %v1579_v7  ;;  %v2043_v10 = vpop.f32.mrb[10].mxu1  ;;  %v1664_v14 = vadd.f32 0.5, %v1661_v3  ;;  %v1638_v29 = vadd.f32 %v2042_v5, %v1623_v55 }
 0x1ea   : > { %v1582_v12 = vpop.f32.mrb[11].mxu1  ;;  %v1641_v21 = vadd.f32 %v2043_v10, %v1628_v51  ;;  %v1684_v24 = vmul.f32 %v1681_v13, %v1663_v11 }
 0x1eb   : > { %v1644_v15 = vmul.f32 0.5, %v1632_v9  ;;  %v1635_v16 = vadd.f32 %v1618_v34, %v1582_v12  ;;  %v2234_v19 = vpop.eup %2233  ;;  %v1685_v26 = vmul.f32 %v1682_v18, %v1664_v14  ;;  %v1668_v32 = vmul.f32 0.5, %v1638_v29 }
 0x1ec   : > { %v2236_v23 = vpop.eup %2235  ;;  %v1687_v25 = vmul.f32 %v2234_v19, %v1651_v17 }
 0x1ed   : > { %2241 = vtanh.f32 %v1644_v15  ;;  %v1656_v22 = vmul.f32 0.5, %v1635_v16  ;;  %v1688_v0 = vmul.f32 %v2236_v23, %v1652_v20  ;;  %v2238_v30 = vpop.eup %2237 }
 0x1ee   : > { %v1690_v27 = vadd.f32 %v1687_v25, %v1684_v24  ;;  %v2240_v31 = vpop.eup %2239  ;;  %v1672_v34 = vmul.f32 0.5, %v2238_v30 }
 0x1ef   : > { %2243 = vtanh.f32 %v1656_v22  ;;  %v1691_v28 = vadd.f32 %v1688_v0, %v1685_v26  ;;  %v1673_v35 = vmul.f32 0.5, %v2240_v31 }
 0x1f0   : > { %2245 = vtanh.f32 %v1641_v21  ;;  %1699 = vst [vmem:[%s2640_s7] sm:$0xff] %v1690_v27  ;;  %v1675_v41 = vadd.f32 0.5, %v1672_v34 }
 0x1f1   : > { %2247 = vtanh.f32 %v1690_v27  ;;  %1700 = vst [vmem:[%s2640_s7 + $0x8] sm:$0xff] %v1691_v28  ;;  %v1676_v44 = vadd.f32 0.5, %v1673_v35 }
 0x1f2   : > { %2249 = vtanh.f32 %v1691_v28 }
 0x1f3   : > { %2251 = vtanh.f32 %v1668_v32 }
 0x1f7   : > { %v2242_v33 = vpop.eup %2241 }
 0x1f8   : > { %v1650_v36 = vmul.f32 0.5, %v2242_v33 }
 0x1f9   : > { %v2244_v37 = vpop.eup %2243 }
 0x1fa   : > { %v1653_v38 = vadd.f32 0.5, %v1650_v36  ;;  %v1662_v39 = vmul.f32 0.5, %v2244_v37  ;;  %v2246_v40 = vpop.eup %2245 }
 0x1fb   : > { %v2248_v43 = vpop.eup %2247 }
 0x1fc   : > { %v1665_v45 = vadd.f32 0.5, %v1662_v39  ;;  %v1689_v46 = vmul.f32 %v2246_v40, %v1653_v38  ;;  %v2250_v47 = vpop.eup %2249  ;;  %v1696_v48 = vmul.f32 %v2248_v43, %v1675_v41 }
 0x1fd   : > { %v1697_v50 = vmul.f32 %v2250_v47, %v1676_v44 }
 0x1fe   : > { %v1686_v49 = vmul.f32 %v1683_v42, %v1665_v45 }
 0x1ff   : > { %v1961_v52 = vpack.c.bf16 %v1697_v50, %v1696_v48 }
 0x200   : > { %v1692_v51 = vadd.f32 %v1689_v46, %v1686_v49 }
 0x201   : > { %1715 = vst [vmem:[%s2655_s15] sm:$0xff] %v1961_v52 }
 0x202   : > { %2253 = vtanh.f32 %v1692_v51  ;;  %1701 = vst [vmem:[%s2640_s7 + $0x10] sm:$0xff] %v1692_v51 }
 0x203   : > { %2268 = shalt.err (!%p2265_p3)
}
 0x204   : > { %s2269_s6 = scalar_lea.hbm %s2651_s14, 384  ;;  %s2273_s8 = scalar_lea.hbm %s2735_s5, 768 }
 0x205   : > { %p2270_p4 = scmp.ne.s32.totalorder %s2651_s14, %s2269_s6  ;;  %p2274_p9 = scmp.lt.u32.totalorder %s2651_s14, %s2735_s5 }
 0x206   : > { %p2275_p10 = scmp.lt.u32.totalorder %s2273_s8, %s2269_s6  ;;  %p2277_p12 = scmp.lt.u32.totalorder %s2269_s6, %s2651_s14 }
 0x207   : > { %p2271_p7 = pnand %p2270_p4, %p2430_p5 }
 0x208   : > { %p2276_p11 = por %p2275_p10, %p2274_p9 }
 0x209   : > { %p2272_p8 = pneg %p2271_p7 }
 0x20a   : > { %p2278_p13 = por %p2277_p12, %p2276_p11 }
 0x20c   : > { %p2279_p0 = pnand %p2278_p13, %p2272_p8 }
 0x20e   : > { %2282 = shalt.err (!%p2279_p0)
}
 0x20f   : > { %2146 = dma.vmem_to_hbm [thread:$0]  (%p2430_p5), %s2653_s11, 384, %s2651_s14, %s1723_s16   ;;  %v2252_v53 = vpop.eup %2251 }
 0x210   : > { %v1674_v54 = vmul.f32 0.5, %v2252_v53  ;;  %s2143_s13 = smul.u32 192, %s2413_s22  ;;  %v2254_v56 = vpop.eup %2253  ;;  %s1737_s17 = sshll.u32 %s2655_s15, 4  ;;  %s2688_s17 = int_to_ptr.vmem [resolvable:$true] %s1737_s17 }
 0x211   : > { %s1718_s11 = scalar_lea.sflag [#allocation3], %s2635_s9  ;;  %s2283_s14 = scalar_lea.vmem %s2688_s17, 192 }
 0x212   : > { %v1677_v55 = vadd.f32 0.5, %v1674_v54  ;;  %s2686_s26 = scalar_lea.hbm %s2734_s4, %s2143_s13  ;;  %p2284_p1 = scmp.ne.s32.totalorder %s2688_s17, %s2283_s14 }
 0x213   : > { %s2361_s22 = smov [#allocation2]  }
 0x214   : > { %v1698_v57 = vmul.f32 %v2254_v56, %v1677_v55  ;;  %p2285_p2 = pnand %p2284_p1, %p2430_p5  ;;  %s2287_s16 = sshll.u32 %s2361_s22, 4  ;;  %s2288_s16 = int_to_ptr.vmem [resolvable:$false] %s2287_s16 }
 0x215   : > { %s2289_s6 = scalar_lea.vmem %s2288_s16, 384  ;;  %p2290_p4 = scmp.lt.s32.totalorder %s2688_s17, %s2288_s16 }
 0x216   : > { %v1962_v58 = vpack.c.bf16 %v1698_v57, %v1698_v57  ;;  %p2286_p3 = pneg %p2285_p2  ;;  %p2291_p7 = scmp.lt.s32.totalorder %s2289_s6, %s2283_s14 }
 0x218   : > { %1716 = vst [vmem:[%s2655_s15 + $0x8] sm:$0xf] %v1962_v58  ;;  %p2292_p8 = por %p2291_p7, %p2290_p4 }
 0x21a   : > { %p2293_p9 = pnand %p2292_p8, %p2286_p3 }
 0x21c   : > { %2296 = shalt.err (!%p2293_p9)
}
 0x21d   : > { %s2297_s9 = scalar_lea.hbm %s2686_s26, 192  ;;  %s2301_s7 = scalar_lea.hbm %s2734_s4, 384 }
 0x21e   : > { %p2298_p10 = scmp.ne.s32.totalorder %s2686_s26, %s2297_s9  ;;  %p2302_p13 = scmp.lt.u32.totalorder %s2686_s26, %s2734_s4 }
 0x21f   : > { %p2303_p0 = scmp.lt.u32.totalorder %s2301_s7, %s2297_s9  ;;  %p2305_p2 = scmp.lt.u32.totalorder %s2297_s9, %s2686_s26 }
 0x220   : > { %p2299_p11 = pnand %p2298_p10, %p2430_p5 }
 0x221   : > { %p2304_p1 = por %p2303_p0, %p2302_p13 }
 0x222   : > { %p2300_p12 = pneg %p2299_p11 }
 0x223   : > { %p2306_p3 = por %p2305_p2, %p2304_p1 }
 0x225   : > { %p2307_p4 = pnand %p2306_p3, %p2300_p12 }
 0x227   : > { %2310 = shalt.err (!%p2307_p4)
}
 0x228   : > { %2145 = dma.vmem_to_hbm [thread:$0]  (%p2430_p5), %s2688_s17, 192, %s2686_s26, %s1718_s11  }
 0x229 PF: > { %p2156_p7 = scmp.ge.s32.totalorder %s2349_s21, 2  ;;  %s1763_s12 = sand.u32 1, %s2337_s18  }
 0x22a   : > { %s1764_s13 = scalar_lea.sflag [#allocation3], %s1763_s12 }
 0x22b   : > { %p2150_p8 = pnand %p2156_p7, %p2434_p6 }
 0x22d   : > { %2328 = dma.done.wait (!%p2150_p8), %s1764_s13, 192  }
 0x22e   : > { %2330 = vsyncadd (!%p2150_p8), %s1764_s13, 4294967104  ;;  %s1773_s23 = scalar_lea.sflag [#allocation5], %s1763_s12 }
 0x22f   : > { %2332 = dma.done.wait (!%p2150_p8), %s1773_s23, 384  }
 0x230   : > { %2334 = vsyncadd (!%p2150_p8), %s1773_s23, 4294966912  ;;  %p19_p5 = scmp.ge.s32.totalorder %s2417_s24, 4   ;;  %s2738_s18 = smov %s2341_s19 }
 0x231   : > { %s2739_s19 = smov %s2345_s20  ;;  %s2740_s20 = smov %s2428_s27 }
 0x232   : > { %s2741_s21 = smov %s2417_s24  ;;  %21 = sbr.rel (!%p19_p5) target bundleno = 5 (0x5), region = 99 }
 0x239   :  { %1778 = vsyncpa [#allocation3], 1 }
 0x23a   :  { %1780 = vsyncpa [#allocation3 + $0x1], 1 }
 0x23b   :  { %1781 = vsyncpa [#allocation5], 1 }
 0x23c   :  { %1783 = vsyncpa [#allocation5 + $0x1], 1 }

</bundles_post_ra>
